<compile_context>
chip_gen: v7x
topology: tpu7x:2x2x1
jax: 0.10.0
libtpu: 0.0.40
codegen_flags: <defaults>
</compile_context>

<pallas_src>
import functools

import jax
import jax.numpy as jnp
from jax.experimental import pallas as pl
from jax.experimental.pallas import tpu as pltpu


_VMEM_LIMIT = 32 * 1024 * 1024  # conservative; fits v7x's 64 MiB physical VMEM


def _round_up(x, m):
    return (x + m - 1) // m * m


def _pick_node_tile(n_pad):
    # Largest tile in {512, 256, 128} that divides the padded node count.
    for t in (512, 256, 128):
        if n_pad % t == 0:
            return t
    return n_pad


# ----------------------------------------------------------------------------
# Kernel 1: feature transform   support = x @ W      (row-tiled, bf16 MXU)
# ----------------------------------------------------------------------------
def _transform_kernel(x_ref, w_ref, o_ref):
    o_ref[...] = jnp.dot(
        x_ref[...], w_ref[...], preferred_element_type=jnp.float32
    ).astype(o_ref.dtype)


def _transform(x, w, tm):
    n_pad, fin = x.shape
    fout = w.shape[1]
    return pl.pallas_call(
        _transform_kernel,
        out_shape=jax.ShapeDtypeStruct((n_pad, fout), jnp.bfloat16),
        grid_spec=pltpu.PrefetchScalarGridSpec(
            num_scalar_prefetch=0,
            grid=(n_pad // tm,),
            in_specs=[
                pl.BlockSpec((tm, fin), lambda i: (i, 0)),
                pl.BlockSpec((fin, fout), lambda i: (0, 0)),
            ],
            out_specs=pl.BlockSpec((tm, fout), lambda i: (i, 0)),
        ),
        compiler_params=pltpu.CompilerParams(
            dimension_semantics=("parallel",),
            vmem_limit_bytes=_VMEM_LIMIT,
        ),
    )(x, w)


# ----------------------------------------------------------------------------
# Kernel 2: aggregation   out = act(adj @ support + b)
#   grid = (row tiles ["parallel"], adj-column reduction tiles ["arbitrary"])
# ----------------------------------------------------------------------------
def _aggregate_kernel(adj_ref, s_ref, b_ref, o_ref, acc_ref, *, activation, n_valid):
    k = pl.program_id(1)

    @pl.when(k == 0)
    def _():
        acc_ref[...] = jnp.zeros_like(acc_ref)

    acc_ref[...] += jnp.dot(
        adj_ref[...], s_ref[...], preferred_element_type=jnp.float32
    )

    @pl.when(k == pl.num_programs(1) - 1)
    def _():
        z = acc_ref[...] + b_ref[...]  # bias broadcast once per row tile
        if activation == "relu":
            o_ref[...] = jnp.maximum(z, 0.0).astype(o_ref.dtype)
        else:  # log_softmax over the (lane-padded) class axis
            col = jax.lax.broadcasted_iota(jnp.int32, z.shape, 1)
            valid = col < n_valid
            zm = jnp.where(valid, z, -jnp.inf)  # exclude padded classes
            z_shift = zm - jnp.max(zm, axis=1, keepdims=True)
            lse = jnp.log(jnp.sum(jnp.exp(z_shift), axis=1, keepdims=True))
            o_ref[...] = jnp.where(valid, z_shift - lse, 0.0).astype(o_ref.dtype)


def _aggregate(adj, support, bias, tm, tk, *, activation, n_valid, out_dtype):
    n_pad = adj.shape[0]
    fout = support.shape[1]
    kernel = functools.partial(
        _aggregate_kernel, activation=activation, n_valid=n_valid
    )
    return pl.pallas_call(
        kernel,
        out_shape=jax.ShapeDtypeStruct((n_pad, fout), out_dtype),
        grid_spec=pltpu.PrefetchScalarGridSpec(
            num_scalar_prefetch=0,
            grid=(n_pad // tm, n_pad // tk),
            in_specs=[
                pl.BlockSpec((tm, tk), lambda i, k: (i, k)),    # adj tile
                pl.BlockSpec((tk, fout), lambda i, k: (k, 0)),  # support tile
                pl.BlockSpec((1, fout), lambda i, k: (0, 0)),   # bias row
            ],
            out_specs=pl.BlockSpec((tm, fout), lambda i, k: (i, 0)),
            scratch_shapes=[pltpu.VMEM((tm, fout), jnp.float32)],
        ),
        compiler_params=pltpu.CompilerParams(
            dimension_semantics=("parallel", "arbitrary"),
            vmem_limit_bytes=_VMEM_LIMIT,
        ),
    )(adj, support, bias)


# ----------------------------------------------------------------------------
# Wrapper: pad / cast, run both GCN layers, slice the result back.
# ----------------------------------------------------------------------------
def gcn_forward(x, adj, w1, b1, w2, b2):
    n, nfeat = x.shape
    nhid = w1.shape[1]
    nclass = w2.shape[1]

    n_pad = _round_up(n, 128)
    tm = _pick_node_tile(n_pad)
    tk = tm
    fi = _round_up(nfeat, 128)
    fh = _round_up(nhid, 128)
    fc = _round_up(nclass, 128)

    bf16 = jnp.bfloat16
    xp = jnp.zeros((n_pad, fi), bf16).at[:n, :nfeat].set(x.astype(bf16))
    adjp = jnp.zeros((n_pad, n_pad), bf16).at[:n, :n].set(adj.astype(bf16))
    w1p = jnp.zeros((fi, fh), bf16).at[:nfeat, :nhid].set(w1.astype(bf16))
    w2p = jnp.zeros((fh, fc), bf16).at[:nhid, :nclass].set(w2.astype(bf16))
    b1p = (
        jnp.zeros((1, fh), jnp.float32)
        .at[:, :nhid]
        .set(b1.reshape(1, -1).astype(jnp.float32))
    )
    b2p = (
        jnp.zeros((1, fc), jnp.float32)
        .at[:, :nclass]
        .set(b2.reshape(1, -1).astype(jnp.float32))
    )

    # Layer 1: h = relu(adj @ (x @ W1) + b1).  support1 is computed once and
    # stays a tiny (N, 128) bf16 array reused across every adj row tile.
    support1 = _transform(xp, w1p, tm)
    h = _aggregate(
        adjp, support1, b1p, tm, tk,
        activation="relu", n_valid=nhid, out_dtype=bf16,
    )

    # Dropout: identity at inference time.

    # Layer 2: z = adj @ (h @ W2) + b2, then log_softmax fused into the
    # aggregation finalize (lane-dense padded output, padding masked to -inf).
    support2 = _transform(h, w2p, tm)
    out = _aggregate(
        adjp, support2, b2p, tm, tk,
        activation="log_softmax", n_valid=nclass, out_dtype=jnp.float32,
    )
    return out[:n, :nclass]


def reference_forward(x, adj, w1, b1, w2, b2):
    h = jnp.maximum(adj @ (x @ w1) + b1, 0.0)
    z = adj @ (h @ w2) + b2
    return jax.nn.log_softmax(z, axis=1)


if __name__ == "__main__":
    # Small shapes consistent with the module: N nodes, nfeat -> nhid -> nclass.
    N, nfeat, nhid, nclass = 16, 8, 32, 8

    key = jax.random.PRNGKey(0)
    k_x, k_adj, k_w1, k_b1, k_w2, k_b2 = jax.random.split(key, 6)

    x = jax.random.normal(k_x, (N, nfeat), dtype=jnp.float32)

    # Symmetric, row-normalized adjacency (with self-loops), typical GCN preprocessing.
    a = (jax.random.uniform(k_adj, (N, N)) > 0.7).astype(jnp.float32)
    a = jnp.maximum(a, a.T) + jnp.eye(N, dtype=jnp.float32)
    adj = a / jnp.sum(a, axis=1, keepdims=True)

    # Deterministic parameter init (uniform, as in GraphConvolution.reset_parameters).
    w1 = jax.random.uniform(k_w1, (nfeat, nhid), minval=-0.3, maxval=0.3, dtype=jnp.float32)
    b1 = jax.random.uniform(k_b1, (1, nhid), minval=-0.3, maxval=0.3, dtype=jnp.float32)
    w2 = jax.random.uniform(k_w2, (nhid, nclass), minval=-0.3, maxval=0.3, dtype=jnp.float32)
    b2 = jax.random.uniform(k_b2, (1, nclass), minval=-0.3, maxval=0.3, dtype=jnp.float32)

    fwd = jax.jit(gcn_forward)
    out = fwd(x, adj, w1, b1, w2, b2)
    out = jax.block_until_ready(out)

    ref = reference_forward(x, adj, w1, b1, w2, b2)
    assert out.shape == (N, nclass)
    # bf16 MXU inputs (f32 accumulation) -> compare at bf16-appropriate tolerance.
    assert jnp.allclose(out, ref, atol=5e-2, rtol=5e-2), "mismatch vs reference"

    print("KERNEL_OK")
</pallas_src>

<mosaic_0001>
module attributes {stable_mosaic.version = 11 : i64} {
  func.func @_transform_kernel(%arg0: i32, %arg1: memref<128x128xbf16, #tpu.memory_space<vmem>>, %arg2: memref<128x128xbf16, #tpu.memory_space<vmem>>, %arg3: memref<128x128xbf16, #tpu.memory_space<vmem>>) attributes {dimension_semantics = [#tpu.dimension_semantics<parallel>], iteration_bounds = array<i64: 1>, scalar_prefetch = 0 : i64, scratch_operands = 0 : i64, tpu.core_type = #tpu.core_type<tc>, window_params = [{transform_indices = @transform_0, window_bounds = array<i64: 128, 128>}, {pipeline_mode = #tpu.pipeline_mode<synchronous>, transform_indices = @transform_1, window_bounds = array<i64: 128, 128>}, {transform_indices = @transform_2, window_bounds = array<i64: 128, 128>}]} {
    %c0 = arith.constant 0 : index
    %c0_0 = arith.constant 0 : index
    %0 = vector.load %arg1[%c0, %c0_0] : memref<128x128xbf16, #tpu.memory_space<vmem>>, vector<128x128xbf16>
    %c0_1 = arith.constant 0 : index
    %c0_2 = arith.constant 0 : index
    %1 = vector.load %arg2[%c0_1, %c0_2] : memref<128x128xbf16, #tpu.memory_space<vmem>>, vector<128x128xbf16>
    %cst = arith.constant dense<0.000000e+00> : vector<128x128xf32>
    %2 = tpu.matmul %0, %1, %cst {dimension_numbers = #tpu.dot_dimension_numbers<[1], [0], [0], [1], [0, 0, 1, 1], [], []>} : vector<128x128xbf16>, vector<128x128xbf16>, vector<128x128xf32> -> vector<128x128xf32>
    %3 = arith.truncf %2 : vector<128x128xf32> to vector<128x128xbf16>
    %c0_3 = arith.constant 0 : index
    %c0_4 = arith.constant 0 : index
    %4 = vector.load %arg3[%c0_3, %c0_4] : memref<128x128xbf16, #tpu.memory_space<vmem>>, vector<128x128xbf16>
    tpu.vector_store %arg3[%c0_3, %c0_4], %3 {strides = array<i32>} : memref<128x128xbf16, #tpu.memory_space<vmem>>, vector<128x128xbf16>,
    return
  }
  func.func @transform_0(%arg0: i32) -> (i32, i32) {
    %c0_i32 = arith.constant 0 : i32
    %c0_i32_0 = arith.constant 0 : i32
    return %arg0, %c0_i32 : i32, i32
  }
  func.func @transform_1(%arg0: i32) -> (i32, i32) {
    %c0_i32 = arith.constant 0 : i32
    %c0_i32_0 = arith.constant 0 : i32
    %c0_i32_1 = arith.constant 0 : i32
    return %c0_i32, %c0_i32_0 : i32, i32
  }
  func.func @transform_2(%arg0: i32) -> (i32, i32) {
    %c0_i32 = arith.constant 0 : i32
    %c0_i32_0 = arith.constant 0 : i32
    return %arg0, %c0_i32 : i32, i32
  }
}

module attributes {stable_mosaic.version = 11 : i64} {
  func.func @_aggregate_kernel(%arg0: i32, %arg1: i32, %arg2: memref<128x128xbf16, #tpu.memory_space<vmem>>, %arg3: memref<128x128xbf16, #tpu.memory_space<vmem>>, %arg4: memref<1x128xf32, #tpu.memory_space<vmem>>, %arg5: memref<128x128xbf16, #tpu.memory_space<vmem>>, %arg6: memref<128x128xf32, #tpu.memory_space<vmem>>) attributes {dimension_semantics = [#tpu.dimension_semantics<parallel>, #tpu.dimension_semantics<arbitrary>], iteration_bounds = array<i64: 1, 1>, scalar_prefetch = 0 : i64, scratch_operands = 1 : i64, tpu.core_type = #tpu.core_type<tc>, window_params = [{transform_indices = @transform_0, window_bounds = array<i64: 128, 128>}, {transform_indices = @transform_1, window_bounds = array<i64: 128, 128>}, {pipeline_mode = #tpu.pipeline_mode<synchronous>, transform_indices = @transform_2, window_bounds = array<i64: 1, 128>}, {transform_indices = @transform_3, window_bounds = array<i64: 128, 128>}]} {
    %c0_i32 = arith.constant 0 : i32
    %0 = arith.cmpi eq, %arg1, %c0_i32 : i32
    %1 = arith.extui %0 : i1 to i32
    %c0_i32_0 = arith.constant 0 : i32
    %2 = arith.cmpi ne, %1, %c0_i32_0 : i32
    scf.if %2 {
      %cst_10 = arith.constant 0.000000e+00 : f32
      %12 = vector.broadcast %cst_10 : f32 to vector<128x128xf32>
      %c0_11 = arith.constant 0 : index
      %c0_12 = arith.constant 0 : index
      %13 = vector.load %arg6[%c0_11, %c0_12] : memref<128x128xf32, #tpu.memory_space<vmem>>, vector<128x128xf32>
      tpu.vector_store %arg6[%c0_11, %c0_12], %12 {strides = array<i32>} : memref<128x128xf32, #tpu.memory_space<vmem>>, vector<128x128xf32>,
    } else {
    }
    %c0 = arith.constant 0 : index
    %c0_1 = arith.constant 0 : index
    %3 = vector.load %arg6[%c0, %c0_1] : memref<128x128xf32, #tpu.memory_space<vmem>>, vector<128x128xf32>
    %c0_2 = arith.constant 0 : index
    %c0_3 = arith.constant 0 : index
    %4 = vector.load %arg2[%c0_2, %c0_3] : memref<128x128xbf16, #tpu.memory_space<vmem>>, vector<128x128xbf16>
    %c0_4 = arith.constant 0 : index
    %c0_5 = arith.constant 0 : index
    %5 = vector.load %arg3[%c0_4, %c0_5] : memref<128x128xbf16, #tpu.memory_space<vmem>>, vector<128x128xbf16>
    %cst = arith.constant dense<0.000000e+00> : vector<128x128xf32>
    %6 = tpu.matmul %4, %5, %cst {dimension_numbers = #tpu.dot_dimension_numbers<[1], [0], [0], [1], [0, 0, 1, 1], [], []>} : vector<128x128xbf16>, vector<128x128xbf16>, vector<128x128xf32> -> vector<128x128xf32>
    %7 = arith.addf %3, %6 : vector<128x128xf32>
    %c0_6 = arith.constant 0 : index
    %c0_7 = arith.constant 0 : index
    %8 = vector.load %arg6[%c0_6, %c0_7] : memref<128x128xf32, #tpu.memory_space<vmem>>, vector<128x128xf32>
    tpu.vector_store %arg6[%c0_6, %c0_7], %7 {strides = array<i32>} : memref<128x128xf32, #tpu.memory_space<vmem>>, vector<128x128xf32>,
    %c0_i32_8 = arith.constant 0 : i32
    %9 = arith.cmpi eq, %arg1, %c0_i32_8 : i32
    %10 = arith.extui %9 : i1 to i32
    %c0_i32_9 = arith.constant 0 : i32
    %11 = arith.cmpi ne, %10, %c0_i32_9 : i32
    scf.if %11 {
      %c0_10 = arith.constant 0 : index
      %c0_11 = arith.constant 0 : index
      %12 = vector.load %arg6[%c0_10, %c0_11] : memref<128x128xf32, #tpu.memory_space<vmem>>, vector<128x128xf32>
      %c0_12 = arith.constant 0 : index
      %c0_13 = arith.constant 0 : index
      %13 = vector.load %arg4[%c0_12, %c0_13] : memref<1x128xf32, #tpu.memory_space<vmem>>, vector<1x128xf32>
      %14 = vector.broadcast %13 : vector<1x128xf32> to vector<128x128xf32>
      %15 = arith.addf %12, %14 : vector<128x128xf32>
      %cst_14 = arith.constant 0.000000e+00 : f32
      %16 = vector.broadcast %cst_14 : f32 to vector<128x128xf32>
      %17 = arith.maximumf %15, %16 : vector<128x128xf32>
      %18 = arith.truncf %17 : vector<128x128xf32> to vector<128x128xbf16>
      %c0_15 = arith.constant 0 : index
      %c0_16 = arith.constant 0 : index
      %19 = vector.load %arg5[%c0_15, %c0_16] : memref<128x128xbf16, #tpu.memory_space<vmem>>, vector<128x128xbf16>
      tpu.vector_store %arg5[%c0_15, %c0_16], %18 {strides = array<i32>} : memref<128x128xbf16, #tpu.memory_space<vmem>>, vector<128x128xbf16>,
    } else {
    }
    return
  }
  func.func @transform_0(%arg0: i32, %arg1: i32) -> (i32, i32) {
    %c0_i32 = arith.constant 0 : i32
    return %arg0, %arg1 : i32, i32
  }
  func.func @transform_1(%arg0: i32, %arg1: i32) -> (i32, i32) {
    %c0_i32 = arith.constant 0 : i32
    %c0_i32_0 = arith.constant 0 : i32
    return %arg1, %c0_i32 : i32, i32
  }
  func.func @transform_2(%arg0: i32, %arg1: i32) -> (i32, i32) {
    %c0_i32 = arith.constant 0 : i32
    %c0_i32_0 = arith.constant 0 : i32
    %c0_i32_1 = arith.constant 0 : i32
    return %c0_i32, %c0_i32_0 : i32, i32
  }
  func.func @transform_3(%arg0: i32, %arg1: i32) -> (i32, i32) {
    %c0_i32 = arith.constant 0 : i32
    %c0_i32_0 = arith.constant 0 : i32
    return %arg0, %c0_i32 : i32, i32
  }
}

module attributes {stable_mosaic.version = 11 : i64} {
  func.func @_aggregate_kernel(%arg0: i32, %arg1: i32, %arg2: memref<128x128xbf16, #tpu.memory_space<vmem>>, %arg3: memref<128x128xbf16, #tpu.memory_space<vmem>>, %arg4: memref<1x128xf32, #tpu.memory_space<vmem>>, %arg5: memref<128x128xf32, #tpu.memory_space<vmem>>, %arg6: memref<128x128xf32, #tpu.memory_space<vmem>>) attributes {dimension_semantics = [#tpu.dimension_semantics<parallel>, #tpu.dimension_semantics<arbitrary>], iteration_bounds = array<i64: 1, 1>, scalar_prefetch = 0 : i64, scratch_operands = 1 : i64, tpu.core_type = #tpu.core_type<tc>, window_params = [{transform_indices = @transform_0, window_bounds = array<i64: 128, 128>}, {transform_indices = @transform_1, window_bounds = array<i64: 128, 128>}, {pipeline_mode = #tpu.pipeline_mode<synchronous>, transform_indices = @transform_2, window_bounds = array<i64: 1, 128>}, {transform_indices = @transform_3, window_bounds = array<i64: 128, 128>}]} {
    %c0_i32 = arith.constant 0 : i32
    %0 = arith.cmpi eq, %arg1, %c0_i32 : i32
    %1 = arith.extui %0 : i1 to i32
    %c0_i32_0 = arith.constant 0 : i32
    %2 = arith.cmpi ne, %1, %c0_i32_0 : i32
    scf.if %2 {
      %cst_10 = arith.constant 0.000000e+00 : f32
      %12 = vector.broadcast %cst_10 : f32 to vector<128x128xf32>
      %c0_11 = arith.constant 0 : index
      %c0_12 = arith.constant 0 : index
      %13 = vector.load %arg6[%c0_11, %c0_12] : memref<128x128xf32, #tpu.memory_space<vmem>>, vector<128x128xf32>
      tpu.vector_store %arg6[%c0_11, %c0_12], %12 {strides = array<i32>} : memref<128x128xf32, #tpu.memory_space<vmem>>, vector<128x128xf32>,
    } else {
    }
    %c0 = arith.constant 0 : index
    %c0_1 = arith.constant 0 : index
    %3 = vector.load %arg6[%c0, %c0_1] : memref<128x128xf32, #tpu.memory_space<vmem>>, vector<128x128xf32>
    %c0_2 = arith.constant 0 : index
    %c0_3 = arith.constant 0 : index
    %4 = vector.load %arg2[%c0_2, %c0_3] : memref<128x128xbf16, #tpu.memory_space<vmem>>, vector<128x128xbf16>
    %c0_4 = arith.constant 0 : index
    %c0_5 = arith.constant 0 : index
    %5 = vector.load %arg3[%c0_4, %c0_5] : memref<128x128xbf16, #tpu.memory_space<vmem>>, vector<128x128xbf16>
    %cst = arith.constant dense<0.000000e+00> : vector<128x128xf32>
    %6 = tpu.matmul %4, %5, %cst {dimension_numbers = #tpu.dot_dimension_numbers<[1], [0], [0], [1], [0, 0, 1, 1], [], []>} : vector<128x128xbf16>, vector<128x128xbf16>, vector<128x128xf32> -> vector<128x128xf32>
    %7 = arith.addf %3, %6 : vector<128x128xf32>
    %c0_6 = arith.constant 0 : index
    %c0_7 = arith.constant 0 : index
    %8 = vector.load %arg6[%c0_6, %c0_7] : memref<128x128xf32, #tpu.memory_space<vmem>>, vector<128x128xf32>
    tpu.vector_store %arg6[%c0_6, %c0_7], %7 {strides = array<i32>} : memref<128x128xf32, #tpu.memory_space<vmem>>, vector<128x128xf32>,
    %c0_i32_8 = arith.constant 0 : i32
    %9 = arith.cmpi eq, %arg1, %c0_i32_8 : i32
    %10 = arith.extui %9 : i1 to i32
    %c0_i32_9 = arith.constant 0 : i32
    %11 = arith.cmpi ne, %10, %c0_i32_9 : i32
    scf.if %11 {
      %c0_10 = arith.constant 0 : index
      %c0_11 = arith.constant 0 : index
      %12 = vector.load %arg6[%c0_10, %c0_11] : memref<128x128xf32, #tpu.memory_space<vmem>>, vector<128x128xf32>
      %c0_12 = arith.constant 0 : index
      %c0_13 = arith.constant 0 : index
      %13 = vector.load %arg4[%c0_12, %c0_13] : memref<1x128xf32, #tpu.memory_space<vmem>>, vector<1x128xf32>
      %14 = vector.broadcast %13 : vector<1x128xf32> to vector<128x128xf32>
      %15 = arith.addf %12, %14 : vector<128x128xf32>
      %16 = tpu.iota {dimensions = array<i32: 1>} : vector<128x128xi32>
      %c8_i32 = arith.constant 8 : i32
      %17 = vector.broadcast %c8_i32 : i32 to vector<128x128xi32>
      %18 = arith.cmpi slt, %16, %17 : vector<128x128xi32>
      %cst_14 = arith.constant 0xFF800000 : f32
      %19 = vector.broadcast %cst_14 : f32 to vector<128x128xf32>
      %20 = arith.select %18, %15, %19 : vector<128x128xi1>, vector<128x128xf32>
      %cst_15 = arith.constant dense<0xFF800000> : vector<128xf32>
      %21 = vector.multi_reduction <maximumf>, %20, %cst_15 [1] : vector<128x128xf32> to vector<128xf32>
      %22 = vector.shape_cast %21 : vector<128xf32> to vector<128x1xf32>
      %23 = vector.broadcast %22 : vector<128x1xf32> to vector<128x128xf32>
      %24 = arith.subf %20, %23 : vector<128x128xf32>
      %25 = math.exp %24 : vector<128x128xf32>
      %cst_16 = arith.constant dense<0.000000e+00> : vector<128xf32>
      %26 = vector.multi_reduction <add>, %25, %cst_16 [1] : vector<128x128xf32> to vector<128xf32>
      %27 = vector.shape_cast %26 : vector<128xf32> to vector<128x1xf32>
      %28 = math.log %27 : vector<128x1xf32>
      %29 = vector.broadcast %28 : vector<128x1xf32> to vector<128x128xf32>
      %30 = arith.subf %24, %29 : vector<128x128xf32>
      %cst_17 = arith.constant 0.000000e+00 : f32
      %31 = vector.broadcast %cst_17 : f32 to vector<128x128xf32>
      %32 = arith.select %18, %30, %31 : vector<128x128xi1>, vector<128x128xf32>
      %c0_18 = arith.constant 0 : index
      %c0_19 = arith.constant 0 : index
      %33 = vector.load %arg5[%c0_18, %c0_19] : memref<128x128xf32, #tpu.memory_space<vmem>>, vector<128x128xf32>
      tpu.vector_store %arg5[%c0_18, %c0_19], %32 {strides = array<i32>} : memref<128x128xf32, #tpu.memory_space<vmem>>, vector<128x128xf32>,
    } else {
    }
    return
  }
  func.func @transform_0(%arg0: i32, %arg1: i32) -> (i32, i32) {
    %c0_i32 = arith.constant 0 : i32
    return %arg0, %arg1 : i32, i32
  }
  func.func @transform_1(%arg0: i32, %arg1: i32) -> (i32, i32) {
    %c0_i32 = arith.constant 0 : i32
    %c0_i32_0 = arith.constant 0 : i32
    return %arg1, %c0_i32 : i32, i32
  }
  func.func @transform_2(%arg0: i32, %arg1: i32) -> (i32, i32) {
    %c0_i32 = arith.constant 0 : i32
    %c0_i32_0 = arith.constant 0 : i32
    %c0_i32_1 = arith.constant 0 : i32
    return %c0_i32, %c0_i32_0 : i32, i32
  }
  func.func @transform_3(%arg0: i32, %arg1: i32) -> (i32, i32) {
    %c0_i32 = arith.constant 0 : i32
    %c0_i32_0 = arith.constant 0 : i32
    return %arg0, %c0_i32 : i32, i32
  }
}

</mosaic_0001>

<bundles_post_ra>
// kernel: gcn_forward.4
= control target key start
LH: loop header
LB: loop body
LE: loop exit
PB: predicated region body
PF: predicated region fallthrough
CT: control target
= control target key end

     0   :  { %s583_s1 = inlined_call_operand.vmem [shape: bf16[128,128], index: 1, kind: input, shape index: {}]   ;;  %s584_s0 = inlined_call_operand.vmem [shape: bf16[128,128], index: 0, kind: input, shape index: {}]   ;;  %s585_s2 = inlined_call_operand.vmem [shape: bf16[128,128], index: 2, kind: output, shape index: {}]  }
   0x1   :  { %v480_v0 = vld [vmem:[%s583_s1] sm:$0xff]   ;;  %v481_v1 = vld [vmem:[%s583_s1 + $0x8] sm:$0xff]   ;;  %v482_v2 = vld [vmem:[%s583_s1 + $0x10] sm:$0xff]  }
   0x2   :  { %432 = vmatprep.subr.bf16.mxu0 %v480_v0  ;;  %464 = vmatprep.subr.bf16.mxu1 %v480_v0  ;;  %v483_v3 = vld [vmem:[%s583_s1 + $0x18] sm:$0xff]   ;;  %v488_v4 = vld [vmem:[%s584_s0] sm:$0xff]   ;;  %v485_v7 = vld [vmem:[%s583_s1 + $0x28] sm:$0xff]  }
   0x3   :  { %433 = vmatpush3.bf16.msra.mxu0 %v480_v0  ;;  %472 = vmatpush3.bf16.msra.mxu1 %v480_v0  ;;  %v489_v5 = vld [vmem:[%s584_s0 + $0x20] sm:$0xff]   ;;  %v486_v8 = vld [vmem:[%s583_s1 + $0x30] sm:$0xff]   ;;  %v487_v9 = vld [vmem:[%s583_s1 + $0x38] sm:$0xff]  }
   0x4   :  { %434 = vmatprep.subr.bf16.mxu0 %v481_v1  ;;  %465 = vmatprep.subr.bf16.mxu1 %v481_v1  ;;  %v484_v6 = vld [vmem:[%s583_s1 + $0x20] sm:$0xff]   ;;  %v490_v10 = vld [vmem:[%s584_s0 + $0x8] sm:$0xff]   ;;  %v492_v12 = vld [vmem:[%s584_s0 + $0x10] sm:$0xff]  }
   0x5   :  { %448 = vmatprep.mubr.bf16.mxu0 %v488_v4  ;;  %456 = vmatprep.mubr.bf16.mxu1 %v489_v5  ;;  %v491_v11 = vld [vmem:[%s584_s0 + $0x28] sm:$0xff]   ;;  %v493_v13 = vld [vmem:[%s584_s0 + $0x30] sm:$0xff]   ;;  %v494_v14 = vld [vmem:[%s584_s0 + $0x18] sm:$0xff]  }
   0x6   :  { %v495_v15 = vld [vmem:[%s584_s0 + $0x38] sm:$0xff]  }
   0x7   :  { %435 = vmatpush3.bf16.msra.mxu0 %v481_v1  ;;  %473 = vmatpush3.bf16.msra.mxu1 %v481_v1 }
   0x8   :  { %436 = vmatprep.subr.bf16.mxu0 %v482_v2  ;;  %466 = vmatprep.subr.bf16.mxu1 %v482_v2 }
   0xb   :  { %437 = vmatpush3.bf16.msra.mxu0 %v482_v2  ;;  %474 = vmatpush3.bf16.msra.mxu1 %v482_v2 }
   0xc   :  { %438 = vmatprep.subr.bf16.mxu0 %v483_v3  ;;  %467 = vmatprep.subr.bf16.mxu1 %v483_v3 }
   0xf   :  { %439 = vmatpush3.bf16.msra.mxu0 %v483_v3  ;;  %475 = vmatpush3.bf16.msra.mxu1 %v483_v3 }
  0x10   :  { %440 = vmatprep.subr.bf16.mxu0 %v484_v6  ;;  %468 = vmatprep.subr.bf16.mxu1 %v484_v6 }
  0x13   :  { %441 = vmatpush3.bf16.msra.mxu0 %v484_v6  ;;  %476 = vmatpush3.bf16.msra.mxu1 %v484_v6 }
  0x14   :  { %442 = vmatprep.subr.bf16.mxu0 %v485_v7  ;;  %469 = vmatprep.subr.bf16.mxu1 %v485_v7 }
  0x17   :  { %443 = vmatpush3.bf16.msra.mxu0 %v485_v7  ;;  %477 = vmatpush3.bf16.msra.mxu1 %v485_v7 }
  0x18   :  { %444 = vmatprep.subr.bf16.mxu0 %v486_v8  ;;  %470 = vmatprep.subr.bf16.mxu1 %v486_v8 }
  0x1b   :  { %445 = vmatpush3.bf16.msra.mxu0 %v486_v8  ;;  %478 = vmatpush3.bf16.msra.mxu1 %v486_v8 }
  0x1c   :  { %446 = vmatprep.subr.bf16.mxu0 %v487_v9  ;;  %471 = vmatprep.subr.bf16.mxu1 %v487_v9 }
  0x1f   :  { %447 = vmatpush3.bf16.msra.mxu0 %v487_v9  ;;  %479 = vmatpush3.bf16.msra.mxu1 %v487_v9 }
  0x22   :  { %449 = vmatmul.mubr.bf16.vlgmr.msra.gmra.mrb[0].mxu0 %v490_v10  ;;  %457 = vmatmul.mubr.bf16.vlgmr.msra.gmra.mrb[0].mxu1 %v491_v11 }
  0x23   :  { %452 = vmatprep.mubr.bf16.mxu0 %v492_v12  ;;  %460 = vmatprep.mubr.bf16.mxu1 %v493_v13 }
  0x2a   :  { %453 = vmatmul.mubr.bf16.gmra.mrb[4].mxu0 %v494_v14  ;;  %461 = vmatmul.mubr.bf16.gmra.mrb[4].mxu1 %v495_v15 }
  0xf5   :  { %v450_v16 = vpop.f32.mrb[0].mxu0  ;;  %v458_v17 = vpop.f32.mrb[0].mxu1 }
  0xf6   :  { %v174_v18 = vpop.f32.mrb[1].mxu0  ;;  %v206_v19 = vpop.f32.mrb[1].mxu1 }
  0xf7   :  { %v451_v20 = vpop.f32.mrb[2].mxu0  ;;  %v459_v21 = vpop.f32.mrb[2].mxu1 }
  0xf8   :  { %v377_v22 = vpack.c.bf16 %v451_v20, %v450_v16  ;;  %v397_v23 = vpack.c.bf16 %v459_v21, %v458_v17  ;;  %v177_v24 = vpop.f32.mrb[3].mxu0  ;;  %v209_v25 = vpop.f32.mrb[3].mxu1 }
  0xf9   :  { %v372_v26 = vpack.c.bf16 %v177_v24, %v174_v18  ;;  %v392_v27 = vpack.c.bf16 %v209_v25, %v206_v19 }
  0xfa   :  { %409 = vst [vmem:[%s585_s2 + $0x8] sm:$0xff] %v377_v22   ;;  %413 = vst [vmem:[%s585_s2 + $0x28] sm:$0xff] %v397_v23  }
  0xfb   :  { %373 = vst [vmem:[%s585_s2] sm:$0xff] %v372_v26   ;;  %412 = vst [vmem:[%s585_s2 + $0x20] sm:$0xff] %v392_v27  }
  0xfd   :  { %v454_v28 = vpop.f32.mrb[4].mxu0  ;;  %v462_v29 = vpop.f32.mrb[4].mxu1 }
  0xfe   :  { %v190_v30 = vpop.f32.mrb[5].mxu0  ;;  %v222_v31 = vpop.f32.mrb[5].mxu1 }
  0xff   :  { %v455_v32 = vpop.f32.mrb[6].mxu0  ;;  %v463_v33 = vpop.f32.mrb[6].mxu1 }
 0x100   :  { %v387_v34 = vpack.c.bf16 %v455_v32, %v454_v28  ;;  %v407_v35 = vpack.c.bf16 %v463_v33, %v462_v29  ;;  %v193_v36 = vpop.f32.mrb[7].mxu0  ;;  %v225_v37 = vpop.f32.mrb[7].mxu1 }
 0x101   :  { %v382_v38 = vpack.c.bf16 %v193_v36, %v190_v30  ;;  %v402_v39 = vpack.c.bf16 %v225_v37, %v222_v31 }
 0x102   :  { %411 = vst [vmem:[%s585_s2 + $0x18] sm:$0xff] %v387_v34   ;;  %415 = vst [vmem:[%s585_s2 + $0x38] sm:$0xff] %v407_v35  }
 0x103   :  { %410 = vst [vmem:[%s585_s2 + $0x10] sm:$0xff] %v382_v38   ;;  %414 = vst [vmem:[%s585_s2 + $0x30] sm:$0xff] %v402_v39  }

// kernel: gcn_forward.5
= control target key start
LH: loop header
LB: loop body
LE: loop exit
PB: predicated region body
PF: predicated region fallthrough
CT: control target
= control target key end

     0   :  { %s721_s1 = inlined_call_operand.vmem [shape: bf16[128,128], index: 1, kind: input, shape index: {}]   ;;  %s722_s0 = inlined_call_operand.vmem [shape: bf16[128,128], index: 0, kind: input, shape index: {}]   ;;  %s723_s2 = inlined_call_operand.vmem [shape: f32[1,128], index: 2, kind: input, shape index: {}]   ;;  %s724_s3 = inlined_call_operand.vmem [shape: bf16[128,128], index: 3, kind: output, shape index: {}]  }
   0x1   :  { %v610_v0 = vld [vmem:[%s721_s1] sm:$0xff]   ;;  %v611_v1 = vld [vmem:[%s721_s1 + $0x8] sm:$0xff]   ;;  %v612_v2 = vld [vmem:[%s721_s1 + $0x10] sm:$0xff]  }
   0x2   :  { %562 = vmatprep.subr.bf16.mxu0 %v610_v0  ;;  %594 = vmatprep.subr.bf16.mxu1 %v610_v0  ;;  %v613_v3 = vld [vmem:[%s721_s1 + $0x18] sm:$0xff]   ;;  %v618_v4 = vld [vmem:[%s722_s0] sm:$0xff]   ;;  %v615_v7 = vld [vmem:[%s721_s1 + $0x28] sm:$0xff]  }
   0x3   :  { %563 = vmatpush3.bf16.msra.mxu0 %v610_v0  ;;  %602 = vmatpush3.bf16.msra.mxu1 %v610_v0  ;;  %v619_v5 = vld [vmem:[%s722_s0 + $0x20] sm:$0xff]   ;;  %v616_v8 = vld [vmem:[%s721_s1 + $0x30] sm:$0xff]   ;;  %v617_v9 = vld [vmem:[%s721_s1 + $0x38] sm:$0xff]  }
   0x4   :  { %564 = vmatprep.subr.bf16.mxu0 %v611_v1  ;;  %595 = vmatprep.subr.bf16.mxu1 %v611_v1  ;;  %v614_v6 = vld [vmem:[%s721_s1 + $0x20] sm:$0xff]   ;;  %v620_v10 = vld [vmem:[%s722_s0 + $0x8] sm:$0xff]   ;;  %v622_v12 = vld [vmem:[%s722_s0 + $0x10] sm:$0xff]  }
   0x5   :  { %578 = vmatprep.mubr.bf16.mxu0 %v618_v4  ;;  %586 = vmatprep.mubr.bf16.mxu1 %v619_v5  ;;  %v621_v11 = vld [vmem:[%s722_s0 + $0x28] sm:$0xff]   ;;  %v623_v13 = vld [vmem:[%s722_s0 + $0x30] sm:$0xff]   ;;  %v624_v14 = vld [vmem:[%s722_s0 + $0x18] sm:$0xff]  }
   0x6   :  { %v625_v15 = vld [vmem:[%s722_s0 + $0x38] sm:$0xff]   ;;  %v466_v16 = vld [vmem:[%s723_s2] ss:$0 sm:$0xff] }
   0x7   :  { %565 = vmatpush3.bf16.msra.mxu0 %v611_v1  ;;  %603 = vmatpush3.bf16.msra.mxu1 %v611_v1 }
   0x8   :  { %566 = vmatprep.subr.bf16.mxu0 %v612_v2  ;;  %596 = vmatprep.subr.bf16.mxu1 %v612_v2 }
   0xb   :  { %567 = vmatpush3.bf16.msra.mxu0 %v612_v2  ;;  %604 = vmatpush3.bf16.msra.mxu1 %v612_v2 }
   0xc   :  { %568 = vmatprep.subr.bf16.mxu0 %v613_v3  ;;  %597 = vmatprep.subr.bf16.mxu1 %v613_v3 }
   0xf   :  { %569 = vmatpush3.bf16.msra.mxu0 %v613_v3  ;;  %605 = vmatpush3.bf16.msra.mxu1 %v613_v3 }
  0x10   :  { %570 = vmatprep.subr.bf16.mxu0 %v614_v6  ;;  %598 = vmatprep.subr.bf16.mxu1 %v614_v6 }
  0x13   :  { %571 = vmatpush3.bf16.msra.mxu0 %v614_v6  ;;  %606 = vmatpush3.bf16.msra.mxu1 %v614_v6 }
  0x14   :  { %572 = vmatprep.subr.bf16.mxu0 %v615_v7  ;;  %599 = vmatprep.subr.bf16.mxu1 %v615_v7 }
  0x17   :  { %573 = vmatpush3.bf16.msra.mxu0 %v615_v7  ;;  %607 = vmatpush3.bf16.msra.mxu1 %v615_v7 }
  0x18   :  { %574 = vmatprep.subr.bf16.mxu0 %v616_v8  ;;  %600 = vmatprep.subr.bf16.mxu1 %v616_v8 }
  0x1b   :  { %575 = vmatpush3.bf16.msra.mxu0 %v616_v8  ;;  %608 = vmatpush3.bf16.msra.mxu1 %v616_v8 }
  0x1c   :  { %576 = vmatprep.subr.bf16.mxu0 %v617_v9  ;;  %601 = vmatprep.subr.bf16.mxu1 %v617_v9 }
  0x1f   :  { %577 = vmatpush3.bf16.msra.mxu0 %v617_v9  ;;  %609 = vmatpush3.bf16.msra.mxu1 %v617_v9 }
  0x22   :  { %579 = vmatmul.mubr.bf16.vlgmr.msra.gmra.mrb[0].mxu0 %v620_v10  ;;  %587 = vmatmul.mubr.bf16.vlgmr.msra.gmra.mrb[0].mxu1 %v621_v11 }
  0x23   :  { %582 = vmatprep.mubr.bf16.mxu0 %v622_v12  ;;  %590 = vmatprep.mubr.bf16.mxu1 %v623_v13 }
  0x2a   :  { %583 = vmatmul.mubr.bf16.gmra.mrb[4].mxu0 %v624_v14  ;;  %591 = vmatmul.mubr.bf16.gmra.mrb[4].mxu1 %v625_v15 }
  0xf5   :  { %v580_v17 = vpop.f32.mrb[0].mxu0  ;;  %v588_v18 = vpop.f32.mrb[0].mxu1 }
  0xf6   :  { %v336_v19 = vadd.f32 %v580_v17, %v466_v16  ;;  %v344_v20 = vadd.f32 %v588_v18, %v466_v16  ;;  %v213_v21 = vpop.f32.mrb[1].mxu0  ;;  %v245_v22 = vpop.f32.mrb[1].mxu1 }
  0xf7   :  { %v334_v23 = vadd.f32 %v466_v16, %v213_v21  ;;  %v342_v24 = vadd.f32 %v466_v16, %v245_v22  ;;  %v581_v25 = vpop.f32.mrb[2].mxu0  ;;  %v589_v26 = vpop.f32.mrb[2].mxu1 }
  0xf8   :  { %v337_v27 = vadd.f32 %v581_v25, %v466_v16  ;;  %v345_v28 = vadd.f32 %v589_v26, %v466_v16  ;;  %v216_v29 = vpop.f32.mrb[3].mxu0  ;;  %v248_v30 = vpop.f32.mrb[3].mxu1  ;;  %v352_v33 = vmax.f32 %v336_v19, 0.0  ;;  %v360_v34 = vmax.f32 %v344_v20, 0.0 }
  0xf9   :  { %v335_v31 = vadd.f32 %v466_v16, %v216_v29  ;;  %v343_v32 = vadd.f32 %v466_v16, %v248_v30  ;;  %v350_v37 = vmax.f32 %v334_v23, 0.0  ;;  %v358_v38 = vmax.f32 %v342_v24, 0.0 }
  0xfa   :  { %v353_v35 = vmax.f32 %v337_v27, 0.0  ;;  %v361_v36 = vmax.f32 %v345_v28, 0.0 }
  0xfb   :  { %v351_v39 = vmax.f32 %v335_v31, 0.0  ;;  %v359_v40 = vmax.f32 %v343_v32, 0.0 }
  0xfc   :  { %v507_v41 = vpack.c.bf16 %v353_v35, %v352_v33  ;;  %v527_v42 = vpack.c.bf16 %v361_v36, %v360_v34 }
  0xfd   :  { %v502_v43 = vpack.c.bf16 %v351_v39, %v350_v37  ;;  %v522_v44 = vpack.c.bf16 %v359_v40, %v358_v38  ;;  %v584_v45 = vpop.f32.mrb[4].mxu0  ;;  %v592_v46 = vpop.f32.mrb[4].mxu1 }
  0xfe   :  { %539 = vst [vmem:[%s724_s3 + $0x8] sm:$0xff] %v507_v41   ;;  %543 = vst [vmem:[%s724_s3 + $0x28] sm:$0xff] %v527_v42   ;;  %v340_v47 = vadd.f32 %v584_v45, %v466_v16  ;;  %v348_v48 = vadd.f32 %v592_v46, %v466_v16  ;;  %v229_v49 = vpop.f32.mrb[5].mxu0  ;;  %v261_v50 = vpop.f32.mrb[5].mxu1 }
  0xff   :  { %503 = vst [vmem:[%s724_s3] sm:$0xff] %v502_v43   ;;  %542 = vst [vmem:[%s724_s3 + $0x20] sm:$0xff] %v522_v44   ;;  %v338_v51 = vadd.f32 %v466_v16, %v229_v49  ;;  %v346_v52 = vadd.f32 %v466_v16, %v261_v50  ;;  %v585_v53 = vpop.f32.mrb[6].mxu0  ;;  %v593_v54 = vpop.f32.mrb[6].mxu1 }
 0x100   :  { %v341_v55 = vadd.f32 %v585_v53, %v466_v16  ;;  %v349_v56 = vadd.f32 %v593_v54, %v466_v16  ;;  %v232_v57 = vpop.f32.mrb[7].mxu0  ;;  %v264_v58 = vpop.f32.mrb[7].mxu1  ;;  %v356_v61 = vmax.f32 %v340_v47, 0.0  ;;  %v364_v62 = vmax.f32 %v348_v48, 0.0 }
 0x101   :  { %v339_v59 = vadd.f32 %v466_v16, %v232_v57  ;;  %v347_v60 = vadd.f32 %v466_v16, %v264_v58  ;;  %v354_v1 = vmax.f32 %v338_v51, 0.0  ;;  %v362_v2 = vmax.f32 %v346_v52, 0.0 }
 0x102   :  { %v357_v63 = vmax.f32 %v341_v55, 0.0  ;;  %v365_v0 = vmax.f32 %v349_v56, 0.0 }
 0x103   :  { %v355_v3 = vmax.f32 %v339_v59, 0.0  ;;  %v363_v4 = vmax.f32 %v347_v60, 0.0 }
 0x104   :  { %v517_v5 = vpack.c.bf16 %v357_v63, %v356_v61  ;;  %v537_v6 = vpack.c.bf16 %v365_v0, %v364_v62 }
 0x105   :  { %v512_v7 = vpack.c.bf16 %v355_v3, %v354_v1  ;;  %v532_v8 = vpack.c.bf16 %v363_v4, %v362_v2 }
 0x106   :  { %541 = vst [vmem:[%s724_s3 + $0x18] sm:$0xff] %v517_v5   ;;  %545 = vst [vmem:[%s724_s3 + $0x38] sm:$0xff] %v537_v6  }
 0x107   :  { %540 = vst [vmem:[%s724_s3 + $0x10] sm:$0xff] %v512_v7   ;;  %544 = vst [vmem:[%s724_s3 + $0x30] sm:$0xff] %v532_v8  }

// kernel: gcn_forward.7
= control target key start
LH: loop header
LB: loop body
LE: loop exit
PB: predicated region body
PF: predicated region fallthrough
CT: control target
= control target key end

     0   :  { %v350_v16 = vlaneseq  ;;  %s992_s1 = inlined_call_operand.vmem [shape: bf16[128,128], index: 1, kind: input, shape index: {}]   ;;  %s993_s0 = inlined_call_operand.vmem [shape: bf16[128,128], index: 0, kind: input, shape index: {}]   ;;  %s994_s2 = inlined_call_operand.vmem [shape: f32[1,128], index: 2, kind: input, shape index: {}]   ;;  %s995_s3 = inlined_call_operand.vmem [shape: f32[128,128], index: 3, kind: output, shape index: {}]  }
   0x1   :  { %v646_v0 = vld [vmem:[%s992_s1] sm:$0xff]   ;;  %v647_v1 = vld [vmem:[%s992_s1 + $0x8] sm:$0xff]   ;;  %v648_v2 = vld [vmem:[%s992_s1 + $0x10] sm:$0xff]  }
   0x2   :  { %598 = vmatprep.subr.bf16.mxu0 %v646_v0  ;;  %630 = vmatprep.subr.bf16.mxu1 %v646_v0  ;;  %v649_v3 = vld [vmem:[%s992_s1 + $0x18] sm:$0xff]   ;;  %v654_v4 = vld [vmem:[%s993_s0] sm:$0xff]   ;;  %v651_v7 = vld [vmem:[%s992_s1 + $0x28] sm:$0xff]   ;;  %v794_v17 = vand.u32 127, %v350_v16 }
   0x3   :  { %599 = vmatpush3.bf16.msra.mxu0 %v646_v0  ;;  %638 = vmatpush3.bf16.msra.mxu1 %v646_v0  ;;  %v655_v5 = vld [vmem:[%s993_s0 + $0x20] sm:$0xff]   ;;  %v652_v8 = vld [vmem:[%s992_s1 + $0x30] sm:$0xff]   ;;  %v653_v9 = vld [vmem:[%s992_s1 + $0x38] sm:$0xff]  }
   0x4   :  { %600 = vmatprep.subr.bf16.mxu0 %v647_v1  ;;  %631 = vmatprep.subr.bf16.mxu1 %v647_v1  ;;  %v650_v6 = vld [vmem:[%s992_s1 + $0x20] sm:$0xff]   ;;  %v656_v10 = vld [vmem:[%s993_s0 + $0x8] sm:$0xff]   ;;  %v658_v12 = vld [vmem:[%s993_s0 + $0x10] sm:$0xff]   ;;  %vm352_vm0 = vcmp.lt.s32.totalorder %v794_v17, 8 }
   0x5   :  { %614 = vmatprep.mubr.bf16.mxu0 %v654_v4  ;;  %622 = vmatprep.mubr.bf16.mxu1 %v655_v5  ;;  %v657_v11 = vld [vmem:[%s993_s0 + $0x28] sm:$0xff]   ;;  %v660_v13 = vld [vmem:[%s993_s0 + $0x30] sm:$0xff]   ;;  %v659_v14 = vld [vmem:[%s993_s0 + $0x18] sm:$0xff]  }
   0x6   :  { %v661_v15 = vld [vmem:[%s993_s0 + $0x38] sm:$0xff]   ;;  %v581_v18 = vld [vmem:[%s994_s2] ss:$0 sm:$0xff] }
   0x7   :  { %601 = vmatpush3.bf16.msra.mxu0 %v647_v1  ;;  %639 = vmatpush3.bf16.msra.mxu1 %v647_v1 }
   0x8   :  { %602 = vmatprep.subr.bf16.mxu0 %v648_v2  ;;  %632 = vmatprep.subr.bf16.mxu1 %v648_v2 }
   0xb   :  { %603 = vmatpush3.bf16.msra.mxu0 %v648_v2  ;;  %640 = vmatpush3.bf16.msra.mxu1 %v648_v2 }
   0xc   :  { %604 = vmatprep.subr.bf16.mxu0 %v649_v3  ;;  %633 = vmatprep.subr.bf16.mxu1 %v649_v3 }
   0xf   :  { %605 = vmatpush3.bf16.msra.mxu0 %v649_v3  ;;  %641 = vmatpush3.bf16.msra.mxu1 %v649_v3 }
  0x10   :  { %606 = vmatprep.subr.bf16.mxu0 %v650_v6  ;;  %634 = vmatprep.subr.bf16.mxu1 %v650_v6 }
  0x13   :  { %607 = vmatpush3.bf16.msra.mxu0 %v650_v6  ;;  %642 = vmatpush3.bf16.msra.mxu1 %v650_v6 }
  0x14   :  { %608 = vmatprep.subr.bf16.mxu0 %v651_v7  ;;  %635 = vmatprep.subr.bf16.mxu1 %v651_v7 }
  0x17   :  { %609 = vmatpush3.bf16.msra.mxu0 %v651_v7  ;;  %643 = vmatpush3.bf16.msra.mxu1 %v651_v7 }
  0x18   :  { %610 = vmatprep.subr.bf16.mxu0 %v652_v8  ;;  %636 = vmatprep.subr.bf16.mxu1 %v652_v8 }
  0x1b   :  { %611 = vmatpush3.bf16.msra.mxu0 %v652_v8  ;;  %644 = vmatpush3.bf16.msra.mxu1 %v652_v8 }
  0x1c   :  { %612 = vmatprep.subr.bf16.mxu0 %v653_v9  ;;  %637 = vmatprep.subr.bf16.mxu1 %v653_v9 }
  0x1f   :  { %613 = vmatpush3.bf16.msra.mxu0 %v653_v9  ;;  %645 = vmatpush3.bf16.msra.mxu1 %v653_v9 }
  0x22   :  { %615 = vmatmul.mubr.bf16.vlgmr.msra.gmra.mrb[0].mxu0 %v656_v10  ;;  %623 = vmatmul.mubr.bf16.vlgmr.msra.gmra.mrb[0].mxu1 %v657_v11 }
  0x23   :  { %618 = vmatprep.mubr.bf16.mxu0 %v658_v12  ;;  %626 = vmatprep.mubr.bf16.mxu1 %v660_v13 }
  0x2a   :  { %619 = vmatmul.mubr.bf16.gmra.mrb[4].mxu0 %v659_v14  ;;  %627 = vmatmul.mubr.bf16.gmra.mrb[4].mxu1 %v661_v15 }
  0xf5   :  { %v616_v19 = vpop.f32.mrb[0].mxu0  ;;  %v624_v20 = vpop.f32.mrb[0].mxu1 }
  0xf6   :  { %v336_v21 = vadd.f32 %v616_v19, %v581_v18  ;;  %v344_v22 = vadd.f32 %v624_v20, %v581_v18  ;;  %v213_v23 = vpop.f32.mrb[1].mxu0  ;;  %v245_v24 = vpop.f32.mrb[1].mxu1 }
  0xf7   :  { %v617_v25 = vpop.f32.mrb[2].mxu0  ;;  %v625_v26 = vpop.f32.mrb[2].mxu1  ;;  %v334_v27 = vadd.f32 %v581_v18, %v213_v23  ;;  %v342_v33 = vadd.f32 %v581_v18, %v245_v24 }
  0xf8   :  { %v337_v28 = vadd.f32 %v617_v25, %v581_v18  ;;  %v216_v29 = vpop.f32.mrb[3].mxu0  ;;  %v248_v30 = vpop.f32.mrb[3].mxu1  ;;  %v363_v31 = vsel %vm352_vm0, %v344_v22, -inf  ;;  %v355_v32 = vsel %vm352_vm0, %v336_v21, -inf  ;;  %v345_v34 = vadd.f32 %v625_v26, %v581_v18 }
  0xf9   :  { %389 = vmax.xlane.f32.xlu0 %v363_v31  ;;  %373 = vmax.xlane.f32.xlu1 %v355_v32  ;;  %v353_v35 = vsel %vm352_vm0, %v334_v27, -inf  ;;  %v335_v43 = vadd.f32 %v581_v18, %v216_v29  ;;  %v343_v44 = vadd.f32 %v581_v18, %v248_v30  ;;  %v361_v45 = vsel %vm352_vm0, %v342_v33, -inf }
  0xfa   :  { %v356_v36 = vsel %vm352_vm0, %v337_v28, -inf  ;;  %v364_v46 = vsel %vm352_vm0, %v345_v34, -inf }
  0xfb   :  { %v362_v51 = vsel %vm352_vm0, %v343_v44, -inf  ;;  %v354_v52 = vsel %vm352_vm0, %v335_v43, -inf }
  0xfd   :  { %369 = vmax.xlane.f32.xlu0 %v353_v35  ;;  %375 = vmax.xlane.f32.xlu1 %v356_v36  ;;  %v620_v37 = vpop.f32.mrb[4].mxu0  ;;  %v628_v38 = vpop.f32.mrb[4].mxu1 }
  0xfe   :  { %v229_v39 = vpop.f32.mrb[5].mxu0  ;;  %v261_v40 = vpop.f32.mrb[5].mxu1  ;;  %v340_v49 = vadd.f32 %v620_v37, %v581_v18  ;;  %v348_v63 = vadd.f32 %v628_v38, %v581_v18 }
  0xff   :  { %v621_v41 = vpop.f32.mrb[6].mxu0  ;;  %v629_v42 = vpop.f32.mrb[6].mxu1  ;;  %v338_v55 = vadd.f32 %v581_v18, %v229_v39  ;;  %v346_v57 = vadd.f32 %v581_v18, %v261_v40 }
 0x100   :  { %v232_v47 = vpop.f32.mrb[7].mxu0  ;;  %v264_v48 = vpop.f32.mrb[7].mxu1  ;;  %v341_v50 = vadd.f32 %v621_v41, %v581_v18  ;;  %v359_v53 = vsel %vm352_vm0, %v340_v49, -inf  ;;  %v349_v0 = vadd.f32 %v629_v42, %v581_v18  ;;  %v836_v1 = vsel %vm352_vm0, %v348_v63, -inf }
 0x101   :  { %385 = vmax.xlane.f32.xlu0 %v361_v45  ;;  %391 = vmax.xlane.f32.xlu1 %v364_v46  ;;  %v339_v56 = vadd.f32 %v581_v18, %v232_v47  ;;  %v347_v58 = vadd.f32 %v581_v18, %v264_v48  ;;  %v357_v59 = vsel %vm352_vm0, %v338_v55, -inf  ;;  %v826_v61 = vsel %vm352_vm0, %v346_v57, -inf }
 0x102   :  { %v360_v54 = vsel %vm352_vm0, %v341_v50, -inf  ;;  %v840_v2 = vsel %vm352_vm0, %v349_v0, -inf }
 0x103   :  { %v358_v60 = vsel %vm352_vm0, %v339_v56, -inf  ;;  %v830_v62 = vsel %vm352_vm0, %v347_v58, -inf }
 0x105   :  { %387 = vmax.xlane.f32.xlu1 %v362_v51  ;;  %371 = vmax.xlane.f32.xlu0 %v354_v52 }
 0x109   :  { %381 = vmax.xlane.f32.xlu0 %v359_v53  ;;  %383 = vmax.xlane.f32.xlu1 %v360_v54 }
 0x10d   :  { %377 = vmax.xlane.f32.xlu0 %v357_v59  ;;  %379 = vmax.xlane.f32.xlu1 %v358_v60 }
 0x111   :  { %393 = vmax.xlane.f32.xlu0 %v826_v61  ;;  %395 = vmax.xlane.f32.xlu1 %v830_v62 }
 0x115   :  { %397 = vmax.xlane.f32.xlu0 %v836_v1  ;;  %399 = vmax.xlane.f32.xlu1 %v840_v2 }
 0x186   :  { %v390_v3 = vpop.xlane.xlu0 %389  ;;  %v374_v4 = vpop.xlane.xlu1 %373 }
 0x187   :  { %v844_v5 = vsub.f32 %v363_v31, %v390_v3  ;;  %v846_v6 = vsub.f32 %v355_v32, %v374_v4 }
 0x189   :  { %v421_v7 = vmul.f32 1.442695, %v846_v6  ;;  %v437_v10 = vmul.f32 1.442695, %v844_v5 }
 0x18a   :  { %v370_v8 = vpop.xlane.xlu0 %369  ;;  %v376_v9 = vpop.xlane.xlu1 %375 }
 0x18b   :  { %v850_v11 = vsub.f32 %v353_v35, %v370_v8  ;;  %v852_v12 = vsub.f32 %v356_v36, %v376_v9  ;;  %662 = vpow2.f32 %v421_v7 }
 0x18c   :  { %664 = vpow2.f32 %v437_v10 }
 0x18d   :  { %v423_v13 = vmul.f32 1.442695, %v852_v12  ;;  %v417_v16 = vmul.f32 1.442695, %v850_v11 }
 0x18e   :  { %v386_v14 = vpop.xlane.xlu0 %385  ;;  %v392_v15 = vpop.xlane.xlu1 %391 }
 0x18f   :  { %v856_v18 = vsub.f32 %v361_v45, %v386_v14  ;;  %v858_v19 = vsub.f32 %v364_v46, %v392_v15  ;;  %666 = vpow2.f32 %v423_v13 }
 0x190   :  { %668 = vpow2.f32 %v417_v16 }
 0x191   :  { %v439_v20 = vmul.f32 1.442695, %v858_v19  ;;  %v433_v23 = vmul.f32 1.442695, %v856_v18 }
 0x192   :  { %v388_v21 = vpop.xlane.xlu1 %387  ;;  %v372_v22 = vpop.xlane.xlu0 %371 }
 0x193   :  { %v862_v24 = vsub.f32 %v354_v52, %v372_v22  ;;  %670 = vpow2.f32 %v439_v20  ;;  %v864_v25 = vsub.f32 %v362_v51, %v388_v21 }
 0x194   :  { %672 = vpow2.f32 %v433_v23 }
 0x195   :  { %v419_v26 = vmul.f32 1.442695, %v862_v24  ;;  %v663_v27 = vpop.eup %662  ;;  %v435_v31 = vmul.f32 1.442695, %v864_v25 }
 0x196   :  { %v382_v28 = vpop.xlane.xlu0 %381  ;;  %v384_v29 = vpop.xlane.xlu1 %383  ;;  %453 = vadd.xlane.f32.xlu0 %v663_v27 }
 0x197   :  { %v867_v30 = vsub.f32 %v359_v53, %v382_v28  ;;  %674 = vpow2.f32 %v419_v26  ;;  %v870_v32 = vsub.f32 %v360_v54, %v384_v29  ;;  %v665_v33 = vpop.eup %664 }
 0x199   :  { %v429_v34 = vmul.f32 1.442695, %v867_v30  ;;  %v667_v35 = vpop.eup %666  ;;  %v431_v39 = vmul.f32 1.442695, %v870_v32 }
 0x19a   :  { %v378_v36 = vpop.xlane.xlu0 %377  ;;  %v380_v37 = vpop.xlane.xlu1 %379  ;;  %469 = vadd.xlane.f32.xlu0 %v665_v33  ;;  %455 = vadd.xlane.f32.xlu1 %v667_v35 }
 0x19b   :  { %676 = vpow2.f32 %v429_v34  ;;  %v873_v38 = vsub.f32 %v357_v59, %v378_v36  ;;  %v876_v40 = vsub.f32 %v358_v60, %v380_v37  ;;  %v669_v41 = vpop.eup %668 }
 0x19c   :  { %678 = vpow2.f32 %v435_v31 }
 0x19d   :  { %v425_v42 = vmul.f32 1.442695, %v873_v38  ;;  %v671_v43 = vpop.eup %670  ;;  %v427_v47 = vmul.f32 1.442695, %v876_v40 }
 0x19e   :  { %v394_v44 = vpop.xlane.xlu0 %393  ;;  %v396_v45 = vpop.xlane.xlu1 %395  ;;  %449 = vadd.xlane.f32.xlu0 %v669_v41  ;;  %471 = vadd.xlane.f32.xlu1 %v671_v43 }
 0x19f   :  { %680 = vpow2.f32 %v425_v42  ;;  %v880_v46 = vsub.f32 %v826_v61, %v394_v44  ;;  %v884_v48 = vsub.f32 %v830_v62, %v396_v45  ;;  %v673_v49 = vpop.eup %672 }
 0x1a0   :  { %682 = vpow2.f32 %v431_v39 }
 0x1a1   :  { %v441_v50 = vmul.f32 1.442695, %v880_v46  ;;  %v675_v51 = vpop.eup %674  ;;  %v443_v55 = vmul.f32 1.442695, %v884_v48 }
 0x1a2   :  { %v398_v52 = vpop.xlane.xlu0 %397  ;;  %v400_v53 = vpop.xlane.xlu1 %399  ;;  %465 = vadd.xlane.f32.xlu0 %v673_v49  ;;  %451 = vadd.xlane.f32.xlu1 %v675_v51 }
 0x1a3   :  { %684 = vpow2.f32 %v441_v50  ;;  %v888_v54 = vsub.f32 %v836_v1, %v398_v52  ;;  %v892_v56 = vsub.f32 %v840_v2, %v400_v53 }
 0x1a4   :  { %686 = vpow2.f32 %v427_v47 }
 0x1a5   :  { %v677_v57 = vpop.eup %676  ;;  %v445_v58 = vmul.f32 1.442695, %v888_v54  ;;  %v447_v60 = vmul.f32 1.442695, %v892_v56 }
 0x1a6   :  { %v679_v59 = vpop.eup %678  ;;  %461 = vadd.xlane.f32.xlu0 %v677_v57 }
 0x1a7   :  { %688 = vpow2.f32 %v445_v58  ;;  %467 = vadd.xlane.f32.xlu1 %v679_v59 }
 0x1a8   :  { %690 = vpow2.f32 %v443_v55 }
 0x1a9   :  { %v681_v61 = vpop.eup %680  ;;  %692 = vpow2.f32 %v447_v60 }
 0x1aa   :  { %v683_v62 = vpop.eup %682  ;;  %457 = vadd.xlane.f32.xlu0 %v681_v61 }
 0x1ab   :  { %463 = vadd.xlane.f32.xlu1 %v683_v62 }
 0x1ad   :  { %v685_v63 = vpop.eup %684 }
 0x1ae   :  { %v687_v0 = vpop.eup %686  ;;  %473 = vadd.xlane.f32.xlu0 %v685_v63 }
 0x1af   :  { %459 = vadd.xlane.f32.xlu1 %v687_v0 }
 0x1b1   :  { %v689_v1 = vpop.eup %688 }
 0x1b2   :  { %v691_v2 = vpop.eup %690  ;;  %477 = vadd.xlane.f32.xlu0 %v689_v1 }
 0x1b3   :  { %475 = vadd.xlane.f32.xlu1 %v691_v2  ;;  %v693_v3 = vpop.eup %692 }
 0x1b7   :  { %479 = vadd.xlane.f32.xlu1 %v693_v3 }
 0x223   :  { %v454_v4 = vpop.xlane.xlu0 %453 }
 0x224   :  { %694 = vlog2.f32 %v454_v4 }
 0x227   :  { %v470_v7 = vpop.xlane.xlu0 %469  ;;  %v456_v8 = vpop.xlane.xlu1 %455 }
 0x228   :  { %696 = vlog2.f32 %v470_v7 }
 0x229   :  { %698 = vlog2.f32 %v456_v8 }
 0x22b   :  { %v450_v9 = vpop.xlane.xlu0 %449  ;;  %v472_v10 = vpop.xlane.xlu1 %471 }
 0x22c   :  { %700 = vlog2.f32 %v450_v9 }
 0x22d   :  { %702 = vlog2.f32 %v472_v10 }
 0x22e   :  { %v695_v13 = vpop.eup %694 }
 0x22f   :  { %v486_v14 = vmul.f32 0.6931472, %v695_v13  ;;  %v466_v15 = vpop.xlane.xlu0 %465  ;;  %v452_v16 = vpop.xlane.xlu1 %451 }
 0x230   :  { %704 = vlog2.f32 %v466_v15 }
 0x231   :  { %v515_v20 = vsub.f32 %v846_v6, %v486_v14  ;;  %706 = vlog2.f32 %v452_v16 }
 0x232   :  { %v697_v21 = vpop.eup %696 }
 0x233   :  { %v699_v22 = vpop.eup %698  ;;  %v531_v23 = vsel %vm352_vm0, %v515_v20, 0.0  ;;  %v502_v26 = vmul.f32 0.6931472, %v697_v21  ;;  %v462_v27 = vpop.xlane.xlu0 %461 }
 0x234   :  { %v468_v28 = vpop.xlane.xlu1 %467  ;;  %547 = vst [vmem:[%s995_s3 + $0x10] sm:$0xff] %v531_v23  ;;  %v488_v29 = vmul.f32 0.6931472, %v699_v22  ;;  %708 = vlog2.f32 %v462_v27 }
 0x235   :  { %v523_v31 = vsub.f32 %v844_v5, %v502_v26  ;;  %710 = vlog2.f32 %v468_v28 }
 0x236   :  { %v701_v33 = vpop.eup %700  ;;  %v516_v6 = vsub.f32 %v852_v12, %v488_v29 }
 0x237   :  { %v703_v34 = vpop.eup %702  ;;  %v539_v35 = vsel %vm352_vm0, %v523_v31, 0.0  ;;  %v482_v36 = vmul.f32 0.6931472, %v701_v33  ;;  %v458_v37 = vpop.xlane.xlu0 %457 }
 0x238   :  { %v464_v39 = vpop.xlane.xlu1 %463  ;;  %555 = vst [vmem:[%s995_s3 + $0x50] sm:$0xff] %v539_v35  ;;  %v532_v41 = vsel %vm352_vm0, %v516_v6, 0.0  ;;  %v504_v42 = vmul.f32 0.6931472, %v703_v34  ;;  %712 = vlog2.f32 %v458_v37 }
 0x239   :  { %548 = vst [vmem:[%s995_s3 + $0x18] sm:$0xff] %v532_v41  ;;  %v513_v5 = vsub.f32 %v850_v11, %v482_v36  ;;  %714 = vlog2.f32 %v464_v39 }
 0x23a   :  { %v705_v12 = vpop.eup %704  ;;  %v524_v43 = vsub.f32 %v858_v19, %v504_v42 }
 0x23b   :  { %v707_v44 = vpop.eup %706  ;;  %v529_v45 = vsel %vm352_vm0, %v513_v5, 0.0  ;;  %v498_v47 = vmul.f32 0.6931472, %v705_v12  ;;  %v474_v49 = vpop.xlane.xlu0 %473 }
 0x23c   :  { %v460_v50 = vpop.xlane.xlu1 %459  ;;  %545 = vst [vmem:[%s995_s3] sm:$0xff] %v529_v45  ;;  %v540_v51 = vsel %vm352_vm0, %v524_v43, 0.0  ;;  %v484_v52 = vmul.f32 0.6931472, %v707_v44  ;;  %716 = vlog2.f32 %v474_v49 }
 0x23d   :  { %556 = vst [vmem:[%s995_s3 + $0x58] sm:$0xff] %v540_v51  ;;  %v521_v11 = vsub.f32 %v856_v18, %v498_v47  ;;  %718 = vlog2.f32 %v460_v50 }
 0x23e   :  { %v709_v19 = vpop.eup %708  ;;  %v514_v53 = vsub.f32 %v862_v24, %v484_v52 }
 0x23f   :  { %v711_v55 = vpop.eup %710  ;;  %v537_v57 = vsel %vm352_vm0, %v521_v11, 0.0  ;;  %v494_v58 = vmul.f32 0.6931472, %v709_v19  ;;  %v478_v59 = vpop.xlane.xlu0 %477 }
 0x240   :  { %v476_v60 = vpop.xlane.xlu1 %475  ;;  %553 = vst [vmem:[%s995_s3 + $0x40] sm:$0xff] %v537_v57  ;;  %v530_v61 = vsel %vm352_vm0, %v514_v53, 0.0  ;;  %v500_v62 = vmul.f32 0.6931472, %v711_v55  ;;  %720 = vlog2.f32 %v478_v59 }
 0x241   :  { %546 = vst [vmem:[%s995_s3 + $0x8] sm:$0xff] %v530_v61  ;;  %v519_v18 = vsub.f32 %v867_v30, %v494_v58  ;;  %722 = vlog2.f32 %v476_v60 }
 0x242   :  { %v713_v24 = vpop.eup %712  ;;  %v522_v63 = vsub.f32 %v864_v25, %v500_v62 }
 0x243   :  { %v715_v0 = vpop.eup %714  ;;  %v535_v1 = vsel %vm352_vm0, %v519_v18, 0.0  ;;  %v490_v2 = vmul.f32 0.6931472, %v713_v24 }
 0x244   :  { %v480_v3 = vpop.xlane.xlu1 %479  ;;  %551 = vst [vmem:[%s995_s3 + $0x30] sm:$0xff] %v535_v1  ;;  %v538_v4 = vsel %vm352_vm0, %v522_v63, 0.0  ;;  %v496_v7 = vmul.f32 0.6931472, %v715_v0 }
 0x245   :  { %724 = vlog2.f32 %v480_v3  ;;  %554 = vst [vmem:[%s995_s3 + $0x48] sm:$0xff] %v538_v4  ;;  %v517_v25 = vsub.f32 %v873_v38, %v490_v2 }
 0x246   :  { %v717_v30 = vpop.eup %716  ;;  %v520_v8 = vsub.f32 %v870_v32, %v496_v7 }
 0x247   :  { %v719_v9 = vpop.eup %718  ;;  %v533_v10 = vsel %vm352_vm0, %v517_v25, 0.0  ;;  %v506_v13 = vmul.f32 0.6931472, %v717_v30 }
 0x248   :  { %549 = vst [vmem:[%s995_s3 + $0x20] sm:$0xff] %v533_v10  ;;  %v536_v14 = vsel %vm352_vm0, %v520_v8, 0.0  ;;  %v492_v15 = vmul.f32 0.6931472, %v719_v9 }
 0x249   :  { %552 = vst [vmem:[%s995_s3 + $0x38] sm:$0xff] %v536_v14  ;;  %v525_v38 = vsub.f32 %v880_v46, %v506_v13 }
 0x24a   :  { %v721_v32 = vpop.eup %720  ;;  %v518_v16 = vsub.f32 %v876_v40, %v492_v15 }
 0x24b   :  { %v723_v20 = vpop.eup %722  ;;  %v541_v21 = vsel %vm352_vm0, %v525_v38, 0.0  ;;  %v510_v22 = vmul.f32 0.6931472, %v721_v32 }
 0x24c   :  { %557 = vst [vmem:[%s995_s3 + $0x60] sm:$0xff] %v541_v21  ;;  %v534_v23 = vsel %vm352_vm0, %v518_v16, 0.0  ;;  %v508_v26 = vmul.f32 0.6931472, %v723_v20 }
 0x24d   :  { %550 = vst [vmem:[%s995_s3 + $0x28] sm:$0xff] %v534_v23  ;;  %v527_v46 = vsub.f32 %v888_v54, %v510_v22 }
 0x24e   :  { %v526_v27 = vsub.f32 %v884_v48, %v508_v26 }
 0x24f   :  { %v725_v40 = vpop.eup %724  ;;  %v543_v28 = vsel %vm352_vm0, %v527_v46, 0.0 }
 0x250   :  { %v512_v29 = vmul.f32 0.6931472, %v725_v40  ;;  %559 = vst [vmem:[%s995_s3 + $0x70] sm:$0xff] %v543_v28  ;;  %v542_v31 = vsel %vm352_vm0, %v526_v27, 0.0 }
 0x251   :  { %558 = vst [vmem:[%s995_s3 + $0x68] sm:$0xff] %v542_v31 }
 0x252   :  { %v528_v54 = vsub.f32 %v892_v56, %v512_v29 }
 0x254   :  { %v544_v48 = vsel %vm352_vm0, %v528_v54, 0.0 }
 0x255   :  { %560 = vst [vmem:[%s995_s3 + $0x78] sm:$0xff] %v544_v48 }

</bundles_post_ra>
